<compile_context>
chip_gen: v6e
topology: v6e:2x2x1
jax: 0.10.0
libtpu: 0.0.40
codegen_flags: <defaults>
</compile_context>

<pallas_src>
import functools

import jax
import jax.numpy as jnp
from jax.experimental import pallas as pl
from jax.experimental.pallas import tpu as pltpu

LANE = 128
MAX_TILE_ROWS = 2048   # 2048 x 128 f32 = 1 MiB per input block
NCORES = 2             # leading "parallel" grid axis (uses both TCs on v7x)


def _focal_kernel(logits_ref, label_ref, out_ref, acc_ref, *,
                  alpha, gamma, n, tiles_per_core, need_mask):
    c = pl.program_id(0)
    t = pl.program_id(1)

    @pl.when(t == 0)
    def _():
        acc_ref[...] = jnp.zeros_like(acc_ref)

    x = logits_ref[...].astype(jnp.float32)
    y = label_ref[...].astype(jnp.float32)

    # Shared transcendentals: e = exp(-|x|), sp = log1p(e) = softplus(-|x|).
    e = jnp.exp(-jnp.abs(x))
    sp = jnp.log1p(e)
    pos = x >= 0.0

    # Numerically stable log(sigmoid(x)) / log(1 - sigmoid(x)) from sp only.
    log_probs = jnp.where(pos, -sp, x - sp)
    log_1_probs = jnp.where(pos, -x - sp, -sp)

    # sigmoid(x) from the same e (one exact reciprocal).
    r = 1.0 / (1.0 + e)
    probs = jnp.where(pos, r, e * r)

    # coeff = -|label - probs| ** gamma  (special-case integer gammas)
    d = jnp.abs(y - probs)
    if gamma == 2.0:
        coeff = -(d * d)
    elif gamma == 1.0:
        coeff = -d
    else:
        coeff = -(d ** gamma)

    loss = (y * alpha) * log_probs + ((1.0 - y) * (1.0 - alpha)) * log_1_probs
    loss = loss * coeff

    rows, lanes = loss.shape
    if need_mask:
        # Zero out padded / duplicated-tile / OOB-row elements
        # (global flat index >= n).
        base = (c * tiles_per_core + t) * (rows * lanes)
        row = jax.lax.broadcasted_iota(jnp.int32, loss.shape, 0)
        col = jax.lax.broadcasted_iota(jnp.int32, loss.shape, 1)
        flat = base + row * lanes + col
        loss = jnp.where(flat < n, loss, 0.0)

    # Sublane-group tree reduce -> (8, 128) partial, accumulate (vreg adds).
    acc_ref[...] += loss.reshape(rows // 8, 8, lanes).sum(axis=0)

    @pl.when(t == pl.num_programs(1) - 1)
    def _():
        out_ref[...] = acc_ref[...]


def focal_loss(logits, label, alpha=0.25, gamma=2.0, reduction="mean",
               scale=10000.0):
    """Pallas implementation of FocalLossV1.forward (reduction='mean'/'sum')."""
    # TODO(synk): reduction='none' (per-element output) not implemented here.
    assert reduction in ("mean", "sum")

    n = logits.size
    assert label.size == n

    # Keep native dtypes (bf16/int8/bool welcome); cast happens per tile
    # inside the kernel so HBM traffic stays at the native width.
    lf = logits.reshape(-1)
    yf = label.reshape(-1)

    # Pad only to a (8 * 128)-multiple so the lane-dense (rows, 128) reshape
    # is a free bitcast.  Typical shapes need no pad (no extra HBM pass).
    group = 8 * LANE
    padded = ((n + group - 1) // group) * group
    if padded != n:
        lf = jnp.pad(lf, (0, padded - n))
        yf = jnp.pad(yf, (0, padded - n))
    rows = padded // LANE                       # multiple of 8

    l2 = lf.reshape(rows, LANE)
    y2 = yf.reshape(rows, LANE)

    tile_rows = min(MAX_TILE_ROWS, rows)        # multiple of 8
    tiles = pl.cdiv(rows, tile_rows)
    tiles_per_core = pl.cdiv(tiles, NCORES)
    last_tile = tiles - 1

    # Do we cover anything beyond the n real elements (pad tail, partial last
    # tile, or duplicated clamped tiles)?  If not, skip masking entirely.
    covered = NCORES * tiles_per_core * tile_rows * LANE
    need_mask = covered != n

    if NCORES * tiles_per_core == tiles:
        def idx(c, t):
            return (c * tiles_per_core + t, 0)
    else:
        # Clamp so the DMA stays in bounds; the duplicated tiles are fully
        # masked off inside the kernel (their flat index base is >= n).
        def idx(c, t):
            return (jnp.minimum(c * tiles_per_core + t, last_tile), 0)

    kernel = functools.partial(
        _focal_kernel, alpha=float(alpha), gamma=float(gamma), n=n,
        tiles_per_core=tiles_per_core, need_mask=need_mask)

    in_spec = pl.BlockSpec((tile_rows, LANE), idx)
    out_spec = pl.BlockSpec((8, LANE), lambda c, t: (c, 0))

    in_bytes = (l2.size * l2.dtype.itemsize) + (y2.size * y2.dtype.itemsize)
    cost = pl.CostEstimate(flops=25 * n, transcendentals=3 * n,
                           bytes_accessed=in_bytes + NCORES * 8 * LANE * 4)

    partials = pl.pallas_call(
        kernel,
        out_shape=jax.ShapeDtypeStruct((NCORES * 8, LANE), jnp.float32),
        grid_spec=pltpu.PrefetchScalarGridSpec(
            num_scalar_prefetch=0,
            grid=(NCORES, tiles_per_core),
            in_specs=[in_spec, in_spec],
            out_specs=out_spec,
            scratch_shapes=[pltpu.VMEM((8, LANE), jnp.float32)],
        ),
        compiler_params=pltpu.CompilerParams(
            dimension_semantics=("parallel", "arbitrary")),
        cost_estimate=cost,
    )(l2, y2)

    total = jnp.sum(partials)
    if reduction == "mean":
        total = total / n
    return total * scale


def _focal_ref(logits, label, alpha=0.25, gamma=2.0, scale=10000.0):
    """Plain-JAX reference mirroring the PyTorch module (reduction='mean')."""
    x = logits.astype(jnp.float32)
    y = label.astype(jnp.float32)
    probs = jax.nn.sigmoid(x)
    coeff = -(jnp.abs(y - probs) ** gamma)
    log_probs = jnp.where(x >= 0, -jnp.log1p(jnp.exp(-x)),
                          x - jnp.log1p(jnp.exp(x)))
    log_1_probs = jnp.where(x >= 0, -x - jnp.log1p(jnp.exp(-x)),
                            -jnp.log1p(jnp.exp(x)))
    loss = y * alpha * log_probs + (1.0 - y) * (1.0 - alpha) * log_1_probs
    return jnp.mean(loss * coeff) * scale


if __name__ == "__main__":
    key = jax.random.PRNGKey(0)
    k1, k2 = jax.random.split(key)
    # Same convention as the PyTorch docstring (B, C, H, W), small shapes.
    logits = jax.random.normal(k1, (2, 4, 16, 16), dtype=jnp.float32)
    label = jax.random.bernoulli(k2, 0.5, (2, 4, 16, 16)).astype(jnp.float32)

    out = focal_loss(logits, label, alpha=0.25, gamma=2.0, reduction="mean")
    out = jax.block_until_ready(out)

    ref = _focal_ref(logits, label)
    assert jnp.allclose(out, ref, rtol=1e-4, atol=1e-3), (out, ref)
    print("KERNEL_OK")
</pallas_src>

<mosaic_0001>
module attributes {stable_mosaic.version = 11 : i64} {
  func.func @_focal_kernel(%arg0: i32, %arg1: i32, %arg2: memref<16x128xf32, #tpu.memory_space<vmem>>, %arg3: memref<16x128xf32, #tpu.memory_space<vmem>>, %arg4: memref<8x128xf32, #tpu.memory_space<vmem>>, %arg5: memref<8x128xf32, #tpu.memory_space<vmem>>) attributes {dimension_semantics = [#tpu.dimension_semantics<parallel>, #tpu.dimension_semantics<arbitrary>], iteration_bounds = array<i64: 2, 1>, scalar_prefetch = 0 : i64, scratch_operands = 1 : i64, tpu.core_type = #tpu.core_type<tc>, window_params = [{transform_indices = @transform_0, window_bounds = array<i64: 16, 128>}, {transform_indices = @transform_1, window_bounds = array<i64: 16, 128>}, {transform_indices = @transform_2, window_bounds = array<i64: 8, 128>}]} {
    %c0_i32 = arith.constant 0 : i32
    %0 = arith.cmpi eq, %arg1, %c0_i32 : i32
    %1 = arith.extui %0 : i1 to i32
    %c0_i32_0 = arith.constant 0 : i32
    %2 = arith.cmpi ne, %1, %c0_i32_0 : i32
    scf.if %2 {
      %cst_23 = arith.constant 0.000000e+00 : f32
      %65 = vector.broadcast %cst_23 : f32 to vector<8x128xf32>
      %c0_24 = arith.constant 0 : index
      %c0_25 = arith.constant 0 : index
      %66 = vector.load %arg5[%c0_24, %c0_25] : memref<8x128xf32, #tpu.memory_space<vmem>>, vector<8x128xf32>
      tpu.vector_store %arg5[%c0_24, %c0_25], %65 {strides = array<i32>} : memref<8x128xf32, #tpu.memory_space<vmem>>, vector<8x128xf32>,
    } else {
    }
    %c0 = arith.constant 0 : index
    %c0_1 = arith.constant 0 : index
    %3 = vector.load %arg2[%c0, %c0_1] : memref<16x128xf32, #tpu.memory_space<vmem>>, vector<16x128xf32>
    %c0_2 = arith.constant 0 : index
    %c0_3 = arith.constant 0 : index
    %4 = vector.load %arg3[%c0_2, %c0_3] : memref<16x128xf32, #tpu.memory_space<vmem>>, vector<16x128xf32>
    %5 = math.absf %3 : vector<16x128xf32>
    %cst = arith.constant 0.000000e+00 : f32
    %6 = vector.broadcast %cst : f32 to vector<16x128xf32>
    %7 = arith.subf %6, %5 : vector<16x128xf32>
    %8 = math.exp %7 : vector<16x128xf32>
    %9 = math.log1p %8 : vector<16x128xf32>
    %cst_4 = arith.constant 0.000000e+00 : f32
    %10 = vector.broadcast %cst_4 : f32 to vector<16x128xf32>
    %11 = arith.cmpf oge, %3, %10 : vector<16x128xf32>
    %cst_5 = arith.constant 0.000000e+00 : f32
    %12 = vector.broadcast %cst_5 : f32 to vector<16x128xf32>
    %13 = arith.subf %12, %9 : vector<16x128xf32>
    %14 = arith.subf %3, %9 : vector<16x128xf32>
    %15 = arith.select %11, %13, %14 : vector<16x128xi1>, vector<16x128xf32>
    %cst_6 = arith.constant 0.000000e+00 : f32
    %16 = vector.broadcast %cst_6 : f32 to vector<16x128xf32>
    %17 = arith.subf %16, %3 : vector<16x128xf32>
    %18 = arith.subf %17, %9 : vector<16x128xf32>
    %cst_7 = arith.constant 0.000000e+00 : f32
    %19 = vector.broadcast %cst_7 : f32 to vector<16x128xf32>
    %20 = arith.subf %19, %9 : vector<16x128xf32>
    %21 = arith.select %11, %18, %20 : vector<16x128xi1>, vector<16x128xf32>
    %cst_8 = arith.constant 1.000000e+00 : f32
    %22 = vector.broadcast %cst_8 : f32 to vector<16x128xf32>
    %23 = arith.addf %22, %8 : vector<16x128xf32>
    %cst_9 = arith.constant 1.000000e+00 : f32
    %24 = vector.broadcast %cst_9 : f32 to vector<16x128xf32>
    %25 = arith.divf %24, %23 : vector<16x128xf32>
    %26 = arith.mulf %8, %25 : vector<16x128xf32>
    %27 = arith.select %11, %25, %26 : vector<16x128xi1>, vector<16x128xf32>
    %28 = arith.subf %4, %27 : vector<16x128xf32>
    %29 = math.absf %28 : vector<16x128xf32>
    %30 = arith.mulf %29, %29 : vector<16x128xf32>
    %cst_10 = arith.constant 0.000000e+00 : f32
    %31 = vector.broadcast %cst_10 : f32 to vector<16x128xf32>
    %32 = arith.subf %31, %30 : vector<16x128xf32>
    %cst_11 = arith.constant 2.500000e-01 : f32
    %33 = vector.broadcast %cst_11 : f32 to vector<16x128xf32>
    %34 = arith.mulf %4, %33 : vector<16x128xf32>
    %35 = arith.mulf %34, %15 : vector<16x128xf32>
    %cst_12 = arith.constant 1.000000e+00 : f32
    %36 = vector.broadcast %cst_12 : f32 to vector<16x128xf32>
    %37 = arith.subf %36, %4 : vector<16x128xf32>
    %cst_13 = arith.constant 7.500000e-01 : f32
    %38 = vector.broadcast %cst_13 : f32 to vector<16x128xf32>
    %39 = arith.mulf %37, %38 : vector<16x128xf32>
    %40 = arith.mulf %39, %21 : vector<16x128xf32>
    %41 = arith.addf %35, %40 : vector<16x128xf32>
    %42 = arith.mulf %41, %32 : vector<16x128xf32>
    %c1_i32 = arith.constant 1 : i32
    %43 = arith.muli %arg0, %c1_i32 : i32
    %44 = arith.addi %43, %arg1 : i32
    %c2048_i32 = arith.constant 2048 : i32
    %45 = arith.muli %44, %c2048_i32 : i32
    %46 = tpu.iota {dimensions = array<i32: 0>} : vector<16x128xi32>
    %47 = tpu.iota {dimensions = array<i32: 1>} : vector<16x128xi32>
    %c128_i32 = arith.constant 128 : i32
    %48 = vector.broadcast %c128_i32 : i32 to vector<16x128xi32>
    %49 = arith.muli %46, %48 : vector<16x128xi32>
    %50 = vector.broadcast %45 : i32 to vector<16x128xi32>
    %51 = arith.addi %50, %49 : vector<16x128xi32>
    %52 = arith.addi %51, %47 : vector<16x128xi32>
    %c2048_i32_14 = arith.constant 2048 : i32
    %53 = vector.broadcast %c2048_i32_14 : i32 to vector<16x128xi32>
    %54 = arith.cmpi slt, %52, %53 : vector<16x128xi32>
    %cst_15 = arith.constant 0.000000e+00 : f32
    %55 = vector.broadcast %cst_15 : f32 to vector<16x128xf32>
    %56 = arith.select %54, %42, %55 : vector<16x128xi1>, vector<16x128xf32>
    %c0_16 = arith.constant 0 : index
    %c0_17 = arith.constant 0 : index
    %57 = vector.load %arg5[%c0_16, %c0_17] : memref<8x128xf32, #tpu.memory_space<vmem>>, vector<8x128xf32>
    %58 = vector.shape_cast %56 : vector<16x128xf32> to vector<2x8x128xf32>
    %cst_18 = arith.constant dense<0.000000e+00> : vector<8x128xf32>
    %59 = vector.multi_reduction <add>, %58, %cst_18 [0] : vector<2x8x128xf32> to vector<8x128xf32>
    %60 = arith.addf %57, %59 : vector<8x128xf32>
    %c0_19 = arith.constant 0 : index
    %c0_20 = arith.constant 0 : index
    %61 = vector.load %arg5[%c0_19, %c0_20] : memref<8x128xf32, #tpu.memory_space<vmem>>, vector<8x128xf32>
    tpu.vector_store %arg5[%c0_19, %c0_20], %60 {strides = array<i32>} : memref<8x128xf32, #tpu.memory_space<vmem>>, vector<8x128xf32>,
    %c0_i32_21 = arith.constant 0 : i32
    %62 = arith.cmpi eq, %arg1, %c0_i32_21 : i32
    %63 = arith.extui %62 : i1 to i32
    %c0_i32_22 = arith.constant 0 : i32
    %64 = arith.cmpi ne, %63, %c0_i32_22 : i32
    scf.if %64 {
      %c0_23 = arith.constant 0 : index
      %c0_24 = arith.constant 0 : index
      %65 = vector.load %arg5[%c0_23, %c0_24] : memref<8x128xf32, #tpu.memory_space<vmem>>, vector<8x128xf32>
      %c0_25 = arith.constant 0 : index
      %c0_26 = arith.constant 0 : index
      %66 = vector.load %arg4[%c0_25, %c0_26] : memref<8x128xf32, #tpu.memory_space<vmem>>, vector<8x128xf32>
      tpu.vector_store %arg4[%c0_25, %c0_26], %65 {strides = array<i32>} : memref<8x128xf32, #tpu.memory_space<vmem>>, vector<8x128xf32>,
    } else {
    }
    return
  }
  func.func @transform_0(%arg0: i32, %arg1: i32) -> (i32, i32) {
    %c1_i32 = arith.constant 1 : i32
    %0 = arith.muli %arg0, %c1_i32 : i32
    %1 = arith.addi %0, %arg1 : i32
    %c0_i32 = arith.constant 0 : i32
    %2 = arith.minsi %1, %c0_i32 : i32
    %c0_i32_0 = arith.constant 0 : i32
    %c0_i32_1 = arith.constant 0 : i32
    return %2, %c0_i32_0 : i32, i32
  }
  func.func @transform_1(%arg0: i32, %arg1: i32) -> (i32, i32) {
    %c1_i32 = arith.constant 1 : i32
    %0 = arith.muli %arg0, %c1_i32 : i32
    %1 = arith.addi %0, %arg1 : i32
    %c0_i32 = arith.constant 0 : i32
    %2 = arith.minsi %1, %c0_i32 : i32
    %c0_i32_0 = arith.constant 0 : i32
    %c0_i32_1 = arith.constant 0 : i32
    return %2, %c0_i32_0 : i32, i32
  }
  func.func @transform_2(%arg0: i32, %arg1: i32) -> (i32, i32) {
    %c0_i32 = arith.constant 0 : i32
    %c0_i32_0 = arith.constant 0 : i32
    return %arg0, %c0_i32 : i32, i32
  }
}

</mosaic_0001>

<bundles_post_ra>
// kernel: tpu_custom_call.1
= control target key start
LH: loop header
LB: loop body
LE: loop exit
PB: predicated region body
PF: predicated region fallthrough
CT: control target
= control target key end

     0   :  { %7 = vsyncpa [#allocation4], 0  ;;  %s979_s0 = inlined_call_operand.hbm [shape: f32[16,128], index: 0, kind: input, shape index: {}]   ;;  %s980_s1 = inlined_call_operand.hbm [shape: f32[16,128], index: 1, kind: input, shape index: {}]   ;;  %s981_s2 = inlined_call_operand.hbm [shape: f32[16,128], index: 2, kind: output, shape index: {}]  }
   0x1   :  { %9 = vsyncpa [#allocation4 + $0x1], 0 }
   0x2   :  { %10 = vsyncpa [#allocation7], 0 }
   0x3   :  { %12 = vsyncpa [#allocation7 + $0x1], 0 }
   0x4   :  { %13 = vsyncpa [#allocation5], 0 }
   0x5   :  { %15 = vsyncpa [#allocation5 + $0x1], 0  ;;  %s772_s9 = smov 0   ;;  %s774_s10 = smov 0  }
   0x6   :  { %s776_s11 = smov 0   ;;  %s778_s12 = smov 0  }
   0x7   :  { %s780_s13 = smov 0   ;;  %s782_s14 = smov 0  }
   0x8   :  { %s784_s15 = smov 0   ;;  %s786_s16 = smov 0  }
   0x9 LB: > { %s463_s17 = sadd.s32 4294967295, %s750_s16   ;;  %s464_s18 = sadd.s32 4294967294, %s750_s16   ;;  %s750_s16 = sphi %s786_s16, %s21_s16   ;;  %s746_s15 = sphi %s784_s15, %s1000_s15   ;;  %s742_s14 = sphi %s782_s14, %s999_s14   ;;  %s738_s13 = sphi %s780_s13, %s969_s13   ;;  %s734_s12 = sphi %s778_s12, %s998_s12   ;;  %s730_s11 = sphi %s776_s11, %s997_s11   ;;  %s726_s10 = sphi %s774_s10, %s996_s10   ;;  %s722_s9 = sphi %s772_s9, %s995_s9  }
   0xa   : > { %s33_s19 = sadd.s32 1, %s746_s15  ;;  %p719_p1 = scmp.ne.s32.totalorder %s738_s13, 0 }
   0xb   : > { %p35_p0 = scmp.ge.s32.totalorder %s33_s19, 2  ;;  %p54_p2 = scmp.eq.s32.totalorder %s750_s16, 0 }
   0xc   : > { %p59_p3 = scmp.ne.s32.totalorder %s738_s13, %s734_s12  ;;  %p60_p5 = scmp.eq.s32.totalorder %s463_s17, 0 }
   0xd   : > { %s1002_s19 = smov (%p35_p0, %s33_s19), 0  ;;  %p818_p4 = por %p719_p1, %p54_p2 }
   0xe   : > { %p822_p6 = por %p60_p5, %p59_p3  ;;  %s101_s22 = ssub.s32 %s746_s15, %s1002_s19 }
   0xf   : > { %p102_p7 = scmp.eq.s32.totalorder %s101_s22, 0  ;;  %s104_s23 = sadd.s32 1, %s730_s11 }
  0x10   : > { %s985_s21 = scalar_select %p822_p6, 1, 0 }
  0x11   : > { %s830_s24 = scalar_select %p102_p7, %s730_s11, %s104_s23  }
  0x12   : > { %p114_p8 = scmp.ne.s32.totalorder %s730_s11, %s726_s10  ;;  %p115_p9 = scmp.eq.s32.totalorder %s463_s17, 1 }
  0x13   : > { %p120_p10 = scmp.ne.s32.totalorder %s726_s10, %s722_s9  ;;  %p121_p11 = scmp.eq.s32.totalorder %s464_s18, 1 }
  0x14   : > { %p836_p12 = por %p115_p9, %p114_p8  ;;  %p501_p1 = scmp.lt.s32.totalorder %s750_s16, 2 }
  0x15   : > { %p841_p0 = por %p121_p11, %p120_p10  ;;  %s752_s27 = smov [#allocation3]  }
  0x16   : > { %s986_s25 = scalar_select %p836_p12, 1, 0 }
  0x17   : > { %s987_s26 = scalar_select %p841_p0, 1, 0 }
  0x18   : > { %s155_s28 = sshll.u32 %s752_s27, 4  ;;  %p848_p2 = pnand %p501_p1, %p818_p4  ;;  %s156_s28 = int_to_ptr.vmem [resolvable:$true] %s155_s28 }
  0x19   : > { %s589_s4 = scalar_lea.hbm %s979_s0, 256 }
  0x1a   : > { %p590_p3 = scmp.ne.s32.totalorder %s979_s0, %s589_s4  ;;  %p591_p5 = pneg %p848_p2 }
  0x1b   : > { %p596_p8 = scmp.lt.s32.totalorder %s589_s4, %s589_s4 }
  0x1c   : > { %p592_p7 = pnand %p591_p5, %p590_p3 }
  0x1e   : > { %p593_p4 = pneg %p592_p7 }
  0x20   : > { %p598_p9 = pnand %p596_p8, %p593_p4 }
  0x22   : > { %601 = shalt.err (!%p598_p9)
}
  0x23   : > { %s602_s7 = scalar_lea.vmem %s156_s28, 256  ;;  %s609_s8 = scalar_lea.vmem %s156_s28, 512 }
  0x24   : > { %p603_p10 = scmp.ne.s32.totalorder %s156_s28, %s602_s7  ;;  %p610_p13 = scmp.lt.s32.totalorder %s156_s28, %s156_s28 }
  0x25   : > { %p611_p0 = scmp.lt.s32.totalorder %s609_s8, %s602_s7 }
  0x26   : > { %p605_p11 = pnand %p603_p10, %p591_p5 }
  0x27   : > { %p612_p12 = por %p611_p0, %p610_p13 }
  0x28   : > { %p606_p1 = pneg %p605_p11 }
  0x2a   : > { %p613_p6 = pnand %p612_p12, %p606_p1 }
  0x2c   : > { %616 = shalt.err (!%p613_p6)
}
  0x2d   : > { %s753_s12 = smov 128   ;;  %s754_s17 = smov 8  }
  0x2e   : > { %493 = dma.hbm_to_vmem [thread:$0]  (!%p848_p2), %s979_s0, 256, %s156_s28, [#allocation4], %s753_s12, %s753_s12, %s754_s17  }
  0x2f   : > { %p473_p3 = scmp.ge.s32.totalorder %s750_s16, 1  ;;  %p187_p7 = scmp.lt.s32.totalorder %s750_s16, 3 }
  0x30   : > { %s755_s23 = smov [#allocation6]   ;;  %s617_s4 = scalar_lea.hbm %s980_s1, 256 }
  0x31   : > { %p873_p4 = pnand %p473_p3, %p187_p7  ;;  %s179_s27 = sshll.u32 %s755_s23, 4  ;;  %s180_s27 = int_to_ptr.vmem [resolvable:$true] %s179_s27 }
  0x32   : > { %p618_p6 = scmp.ne.s32.totalorder %s980_s1, %s617_s4  ;;  %p624_p0 = scmp.lt.s32.totalorder %s617_s4, %s617_s4 }
  0x33   : > { %s989_s22 = scalar_select %p873_p4, 1, 0 }
  0x34   : > { %p620_p12 = pnand %p618_p6, %p591_p5 }
  0x36   : > { %p621_p13 = pneg %p620_p12 }
  0x38   : > { %p626_p8 = pnand %p624_p0, %p621_p13 }
  0x3a   : > { %629 = shalt.err (!%p626_p8)
}
  0x3b   : > { %s630_s28 = scalar_lea.vmem %s180_s27, 256  ;;  %s637_s7 = scalar_lea.vmem %s180_s27, 512 }
  0x3c   : > { %p631_p9 = scmp.ne.s32.totalorder %s180_s27, %s630_s28  ;;  %p638_p1 = scmp.lt.s32.totalorder %s180_s27, %s180_s27 }
  0x3d   : > { %p639_p3 = scmp.lt.s32.totalorder %s637_s7, %s630_s28 }
  0x3e   : > { %p633_p10 = pnand %p631_p9, %p591_p5 }
  0x3f   : > { %p640_p7 = por %p639_p3, %p638_p1 }
  0x40   : > { %p634_p11 = pneg %p633_p10 }
  0x42   : > { %p641_p4 = pnand %p640_p7, %p634_p11 }
  0x44   : > { %644 = shalt.err (!%p641_p4)
}
  0x45   : > { %496 = dma.hbm_to_vmem [thread:$0]  (!%p848_p2), %s980_s1, 256, %s180_s27, [#allocation7], %s753_s12, %s753_s12, %s754_s17  }
  0x46   : > { %p990_p6 = scmp.ne.s32.totalorder %s989_s22, 0 }
  0x47   : > { %s193_s20 = sand.u32 (!%p990_p6), 1, %s738_s13   ;;  %p991_p5 = scmp.ne.s32.totalorder (!%p990_p6), %s985_s21, 0 }
  0x48   : > { %191 = sbr.rel (%p990_p6) target bundleno = 150 (0x96), region = 28  ;;  %s474_s23 = sshll.u32 (!%p990_p6), %s193_s20, 4 }
  0x49   : > { %s194_s30 = scalar_lea.sflag (!%p990_p6), [#allocation4], %s193_s20  ;;  %s197_s3 = scalar_lea.vmem (!%p990_p6), [#allocation3], %s474_s23 }
  0x4d   : > { %708 = dma.done.wait (%p991_p5), %s194_s30, 256  }
  0x4e   : > { %710 = vsyncadd (%p991_p5), %s194_s30, 4294967040  ;;  %s203_s29 = scalar_lea.sflag [#allocation7], %s193_s20  ;;  %s206_s4 = scalar_lea.vmem [#allocation6], %s474_s23 }
  0x4f   : > { %712 = dma.done.wait (%p991_p5), %s203_s29, 256  }
  0x50   : > { %714 = vsyncadd (%p991_p5), %s203_s29, 4294967040  ;;  %v905_v0 = vld [vmem:[%s197_s3] sm:$0xff]  ;;  %v907_v1 = vld [vmem:[%s197_s3 + $0x8] sm:$0xff]  ;;  %v323_v12 = vlaneseq  ;;  %s477_s21 = sshll.u32 %s742_s14, 11  ;;  %s229_s12 = sand.u32 1, %s726_s10  }
  0x51   : > { %v249_v2 = vand.u32 2147483647, %v905_v0  ;;  %v250_v3 = vand.u32 2147483647, %v907_v1  ;;  %v247_v18 = vld [vmem:[%s206_s4] sm:$0xff]  ;;  %v248_v19 = vld [vmem:[%s206_s4 + $0x8] sm:$0xff]  ;;  %v330_v24 = vstv %s477_s21 }
  0x52   : > { %v324_v14 = vshrl.u32 %v323_v12, 7  ;;  %v327_v25 = vand.u32 127, %v323_v12  ;;  %v311_v27 = vsub.f32 1.0, %v247_v18  ;;  %v312_v28 = vsub.f32 1.0, %v248_v19  ;;  %s476_s17 = sshll.u32 %s229_s12, 3  ;;  %s479_s5 = sshll.u32 %s742_s14, 7 }
  0x53   : > { %v251_v4 = vsub.f32 0.0, %v249_v2  ;;  %v252_v5 = vsub.f32 0.0, %v250_v3  ;;  %v283_v32 = vsub.f32 0.0, %v905_v0  ;;  %vm275_vm2 = vcmp.ge.f32.partialorder %v905_v0, 0.0  ;;  %s231_s22 = scalar_lea.vmem [#allocation8], %s476_s17  ;;  %s360_s7 = scalar_lea.hbm %s981_s2, %s479_s5 }
  0x54   : > { %v325_v17 = vadd.s32 8, %v324_v14  ;;  %v328_v22 = vmul.u32 128, %v324_v14  ;;  %v284_v36 = vsub.f32 0.0, %v907_v1  ;;  %vm276_vm3 = vcmp.ge.f32.partialorder %v907_v1, 0.0  ;;  %s362_s27 = sshll.u32 %s231_s22, 4  ;;  %s349_s8 = scalar_lea.sflag [#allocation5], %s229_s12  ;;  %s363_s27 = int_to_ptr.vmem [resolvable:$true] %s362_s27 }
  0x55   : > { %v253_v6 = vmul.f32 1.442695, %v251_v4  ;;  %v255_v7 = vmul.f32 1.442695, %v252_v5  ;;  %v307_v39 = vmul.f32 0.25, %v247_v18  ;;  %v308_v40 = vmul.f32 0.25, %v248_v19 }
  0x56   : > { %v329_v29 = vmul.u32 128, %v325_v17  ;;  %v331_v33 = vadd.s32 %v330_v24, %v328_v22  ;;  %v313_v44 = vmul.f32 0.75, %v311_v27  ;;  %v314_v45 = vmul.f32 0.75, %v312_v28  ;;  %s645_s18 = scalar_lea.vmem %s363_s27, 128  ;;  %p992_p4 = scmp.ne.s32.totalorder %s986_s25, 0 }
  0x57   : > { %577 = vpow2.f32 %v253_v6  ;;  %p646_p2 = scmp.ne.s32.totalorder %s363_s27, %s645_s18  ;;  %s756_s20 = smov [#allocation8]  }
  0x58   : > { %579 = vpow2.f32 %v255_v7  ;;  %v332_v57 = vadd.s32 %v330_v24, %v329_v29  ;;  %v333_v6 = vadd.s32 %v331_v33, %v327_v25  ;;  %s649_s23 = sshll.u32 %s756_s20, 4  ;;  %s650_s23 = int_to_ptr.vmem [resolvable:$false] %s649_s23 }
  0x59   : > { %p647_p12 = pnand %p646_p2, %p992_p4  ;;  %s651_s14 = scalar_lea.vmem %s650_s23, 256 }
  0x5a   : > { %vm335_vm4 = vcmp.lt.s32.totalorder %v333_v6, 2048  ;;  %p652_p0 = scmp.lt.s32.totalorder %s363_s27, %s650_s23  ;;  %p653_p8 = scmp.lt.s32.totalorder %s651_s14, %s645_s18 }
  0x5b   : > { %p648_p13 = pneg %p647_p12 }
  0x5c   : > { %p654_p9 = por %p653_p8, %p652_p0 }
  0x5e   : > { %p655_p10 = pnand %p654_p9, %p648_p13 }
  0x64   : > { %v578_v8 = vpop.eup %577 }
  0x65   : > { %v580_v9 = vpop.eup %579  ;;  %v257_v10 = vadd.f32 1.0, %v578_v8  ;;  %v260_v13 = vmul.f32 -0.5, %v578_v8  ;;  %v263_v20 = vand.u32 2147483647, %v578_v8 }
  0x66   : > { %v266_v11 = vadd.f32 1.0, %v580_v9  ;;  %v269_v15 = vmul.f32 -0.5, %v580_v9  ;;  %v272_v23 = vand.u32 2147483647, %v580_v9 }
  0x67   : > { %581 = vlog2.f32 %v257_v10  ;;  %v261_v16 = vadd.f32 1.0, %v260_v13  ;;  %vm264_vm0 = vcmp.lt.f32.partialorder %v263_v20, 0.0004427343 }
  0x68   : > { %583 = vlog2.f32 %v266_v11  ;;  %v270_v21 = vadd.f32 1.0, %v269_v15  ;;  %vm273_vm1 = vcmp.lt.f32.partialorder %v272_v23, 0.0004427343 }
  0x69   : > { %585 = vrcp.f32 %v257_v10  ;;  %v262_v26 = vmul.f32 %v578_v8, %v261_v16 }
  0x6a   : > { %587 = vrcp.f32 %v266_v11  ;;  %v271_v31 = vmul.f32 %v580_v9, %v270_v21 }
  0x74   : > { %v582_v30 = vpop.eup %581 }
  0x75   : > { %v584_v34 = vpop.eup %583  ;;  %v259_v35 = vmul.f32 0.6931472, %v582_v30 }
  0x76   : > { %v586_v37 = vpop.eup %585  ;;  %v268_v38 = vmul.f32 0.6931472, %v584_v34 }
  0x77   : > { %v588_v41 = vpop.eup %587  ;;  %v265_v42 = vsel %vm264_vm0, %v262_v26, %v259_v35  ;;  %v295_v43 = vmul.f32 %v586_v37, %v578_v8 }
  0x78   : > { %v274_v46 = vsel %vm273_vm1, %v271_v31, %v268_v38  ;;  %v277_v47 = vsub.f32 0.0, %v265_v42  ;;  %v279_v48 = vsub.f32 %v905_v0, %v265_v42  ;;  %v285_v49 = vsub.f32 %v283_v32, %v265_v42 }
  0x79   : > { %v278_v50 = vsub.f32 0.0, %v274_v46  ;;  %v280_v51 = vsub.f32 %v907_v1, %v274_v46  ;;  %v286_v52 = vsub.f32 %v284_v36, %v274_v46  ;;  %v296_v53 = vmul.f32 %v588_v41, %v580_v9 }
  0x7a   : > { %v281_v54 = vsel %vm275_vm2, %v277_v47, %v279_v48  ;;  %v287_v55 = vsel %vm275_vm2, %v285_v49, %v277_v47  ;;  %v297_v56 = vsel %vm275_vm2, %v586_v37, %v295_v43  ;;  %v334_v9 = vadd.s32 %v332_v57, %v327_v25 }
  0x7b   : > { %v282_v58 = vsel %vm276_vm3, %v278_v50, %v280_v51  ;;  %v288_v59 = vsel %vm276_vm3, %v286_v52, %v278_v50  ;;  %v298_v60 = vsel %vm276_vm3, %v588_v41, %v296_v53  ;;  %v299_v61 = vsub.f32 %v247_v18, %v297_v56 }
  0x7c   : > { %v300_v62 = vsub.f32 %v248_v19, %v298_v60  ;;  %v309_v63 = vmul.f32 %v307_v39, %v281_v54  ;;  %v310_v2 = vmul.f32 %v308_v40, %v282_v58  ;;  %v315_v3 = vmul.f32 %v313_v44, %v287_v55 }
  0x7d   : > { %v301_v4 = vand.u32 2147483647, %v299_v61  ;;  %v316_v5 = vmul.f32 %v314_v45, %v288_v59  ;;  %vm336_vm5 = vcmp.lt.s32.totalorder %v334_v9, 2048 }
  0x7e   : > { %v302_v0 = vand.u32 2147483647, %v300_v62  ;;  %v317_v8 = vadd.f32 %v315_v3, %v309_v63 }
  0x7f   : > { %v303_v7 = vmul.f32 %v301_v4, %v301_v4  ;;  %v318_v11 = vadd.f32 %v316_v5, %v310_v2 }
  0x80   : > { %v304_v10 = vmul.f32 %v302_v0, %v302_v0 }
  0x81   : > { %v305_v1 = vsub.f32 0.0, %v303_v7 }
  0x82   : > { %v306_v12 = vsub.f32 0.0, %v304_v10 }
  0x83   : > { %v319_v13 = vmul.f32 %v317_v8, %v305_v1 }
  0x84   : > { %v320_v14 = vmul.f32 %v318_v11, %v306_v12 }
  0x85   : > { %v337_v15 = vsel %vm335_vm4, %v319_v13, 0.0 }
  0x86   : > { %v338_v16 = vsel %vm336_vm5, %v320_v14, 0.0 }
  0x87   : > { %v340_v17 = vadd.f32 %v338_v16, %v337_v15 }
  0x89   : > { %347 = vst [vmem:[%s231_s22] sm:$0xff] %v340_v17 }
  0x8a   : > { %658 = shalt.err (!%p655_p10)
}
  0x8b   : > { %s659_s30 = scalar_lea.hbm %s360_s7, 128  ;;  %s663_s4 = scalar_lea.hbm %s981_s2, 256 }
  0x8c   : > { %p660_p11 = scmp.ne.s32.totalorder %s360_s7, %s659_s30  ;;  %p664_p7 = scmp.lt.s32.totalorder %s360_s7, %s981_s2 }
  0x8d   : > { %p665_p6 = scmp.lt.s32.totalorder %s663_s4, %s659_s30 }
  0x8e   : > { %p661_p1 = pnand %p660_p11, %p992_p4 }
  0x8f   : > { %p666_p5 = por %p665_p6, %p664_p7 }
  0x90   : > { %p662_p3 = pneg %p661_p1 }
  0x92   : > { %p667_p2 = pnand %p666_p5, %p662_p3 }
  0x94   : > { %670 = shalt.err (!%p667_p2)
}
  0x95   : > { %488 = dma.vmem_to_hbm [thread:$0]  (%p992_p4), %s363_s27, 128, %s360_s7, %s349_s8  }
  0x96 PF: > { %s374_s17 = sand.u32 1, %s722_s9   ;;  %p993_p12 = scmp.ne.s32.totalorder %s987_s26, 0 }
  0x97   : > { %p994_p13 = scmp.ge.s32.totalorder %s750_s16, 2  ;;  %s375_s22 = scalar_lea.sflag [#allocation5], %s374_s17 }
  0x99   : > { %p498_p0 = pnand %p994_p13, %p993_p12 }
  0x9b   : > { %p499_p8 = pneg %p498_p0 }
  0x9d   : > { %716 = dma.done.wait (%p499_p8), %s375_s22, 128  }
  0x9e   : > { %718 = vsyncadd (%p499_p8), %s375_s22, 4294967168  ;;  %s21_s16 = sadd.s32 1, %s750_s16   ;;  %s995_s9 = smov %s726_s10 }
  0x9f   : > { %p18_p9 = scmp.ge.s32.totalorder %s21_s16, 4   ;;  %s996_s10 = smov %s730_s11 }
  0xa0   : > { %s997_s11 = smov %s830_s24  ;;  %s998_s12 = smov %s738_s13 }
  0xa1   : > { %s969_s13 = smov 0   ;;  %s999_s14 = smov %s746_s15 }
  0xa2   : > { %s1000_s15 = smov %s1002_s19  ;;  %20 = sbr.rel (!%p18_p9) target bundleno = 9 (0x9), region = 94 }
  0xa7   :  { %380 = vsyncpa [#allocation4], 1 }
  0xa8   :  { %382 = vsyncpa [#allocation4 + $0x1], 1 }
  0xa9   :  { %383 = vsyncpa [#allocation7], 1 }
  0xaa   :  { %385 = vsyncpa [#allocation7 + $0x1], 1 }
  0xab   :  { %386 = vsyncpa [#allocation5], 1 }
  0xac   :  { %388 = vsyncpa [#allocation5 + $0x1], 1 }

</bundles_post_ra>
